<compile_context>
chip_gen: v7x
topology: tpu7x:2x2x1
jax: 0.10.0
libtpu: 0.0.40
codegen_flags: <defaults>
</compile_context>

<pallas_src>
import functools
import math

import jax
import jax.numpy as jnp
from jax.experimental import pallas as pl
from jax.experimental.pallas import tpu as pltpu


def _round_up(a: int, b: int) -> int:
    return ((a + b - 1) // b) * b


# --------------------------------------------------------------------------
# Stage 1: global average pool over the last (H*W) axis of a (M, HW) slab.
# --------------------------------------------------------------------------
def _gap_kernel(x_ref, o_ref, *, hw_total, block_hw, need_mask):
    j = pl.program_id(1)

    @pl.when(j == 0)
    def _init():
        o_ref[...] = jnp.zeros_like(o_ref)

    x = x_ref[...].astype(jnp.float32)  # no-op for f32 inputs
    if need_mask:
        # Mask out-of-range lanes of the (possibly partial) last HW block so
        # they do not corrupt the row sums.
        col = jax.lax.broadcasted_iota(jnp.int32, x.shape, 1) + j * block_hw
        x = jnp.where(col < hw_total, x, 0.0)

    o_ref[...] += jnp.sum(x, axis=-1, keepdims=True)

    @pl.when(j == pl.num_programs(1) - 1)
    def _finalize():
        o_ref[...] *= (1.0 / hw_total)


# --------------------------------------------------------------------------
# Stage 2: sigmoid(relu(p @ W1.T) @ W2.T)  on the tiny pooled (B, C) vector.
# Weights are passed pre-transposed: w1t = (C, L), w2t = (L, C).
# --------------------------------------------------------------------------
def _fc_kernel(p_ref, w1t_ref, w2t_ref, o_ref):
    p = p_ref[...].astype(jnp.float32)
    w1t = w1t_ref[...].astype(jnp.float32)
    w2t = w2t_ref[...].astype(jnp.float32)

    h = jnp.dot(p, w1t, preferred_element_type=jnp.float32)
    h = jnp.maximum(h, 0.0)
    z = jnp.dot(h, w2t, preferred_element_type=jnp.float32)
    o_ref[...] = (1.0 / (1.0 + jnp.exp(-z))).astype(o_ref.dtype)


def se_block(x, w1, w2, *, target_tile_bytes=4 * 1024 * 1024):
    """SE_Block forward.

    x : (B, C, H, W)
    w1: (L, C)   -- first Linear weight (torch layout: out x in), bias-free
    w2: (C, L)   -- second Linear weight, bias-free
    returns the channel gate of shape (B, C, 1, 1) (matching the PyTorch module).
    """
    B, C, H, W = x.shape
    L = w1.shape[0]
    M = B * C
    HW = H * W

    # Free reshape (contiguous NCHW) -> lane-dense reduction slab.
    x2d = x.reshape(M, HW)

    # ---- tile sizing (keep double-buffered tiles well under scoped VMEM on
    #      all generations, incl. v7x's 64 MiB physical / 32 MiB default). ----
    if HW < 128:
        block_hw = HW                       # full (lane) dim
    else:
        block_hw = min(_round_up(HW, 128), 2048)
    grid_hw = pl.cdiv(HW, block_hw)
    need_mask = (HW % block_hw) != 0

    bytes_per_row = block_hw * x.dtype.itemsize
    desired_m = max(8, (target_tile_bytes // max(bytes_per_row, 1)) // 8 * 8)
    block_m = min(_round_up(M, 8), desired_m)
    grid_m = pl.cdiv(M, block_m)

    gap = functools.partial(
        _gap_kernel, hw_total=HW, block_hw=block_hw, need_mask=need_mask)

    pooled = pl.pallas_call(
        gap,
        out_shape=jax.ShapeDtypeStruct((M, 1), jnp.float32),
        grid_spec=pltpu.PrefetchScalarGridSpec(
            num_scalar_prefetch=0,
            grid=(grid_m, grid_hw),
            in_specs=[pl.BlockSpec((block_m, block_hw), lambda i, j: (i, j))],
            out_specs=pl.BlockSpec((block_m, 1), lambda i, j: (i, 0)),
        ),
        compiler_params=pltpu.CompilerParams(
            dimension_semantics=("parallel", "arbitrary")),
        cost_estimate=pl.CostEstimate(
            flops=M * HW,
            transcendentals=0,
            bytes_accessed=M * HW * x.dtype.itemsize + M * 4),
    )(x2d)

    pooled = pooled.reshape(B, C)           # tiny

    # Pre-transpose the tiny weights in plain JAX (negligible cost).
    w1t = jnp.transpose(w1)                 # (C, L)
    w2t = jnp.transpose(w2)                 # (L, C)

    y = pl.pallas_call(
        _fc_kernel,
        out_shape=jax.ShapeDtypeStruct((B, C), x.dtype),
        grid_spec=pltpu.PrefetchScalarGridSpec(
            num_scalar_prefetch=0,
            grid=(1,),
            in_specs=[
                pl.BlockSpec((B, C), lambda i: (0, 0)),
                pl.BlockSpec((C, L), lambda i: (0, 0)),
                pl.BlockSpec((L, C), lambda i: (0, 0)),
            ],
            out_specs=pl.BlockSpec((B, C), lambda i: (0, 0)),
        ),
        compiler_params=pltpu.CompilerParams(
            dimension_semantics=("arbitrary",)),
    )(pooled, w1t, w2t)

    return y.reshape(B, C, 1, 1)


if __name__ == "__main__":
    key = jax.random.PRNGKey(0)
    k1, k2, k3 = jax.random.split(key, 3)

    B, C, H, W = 2, 4, 16, 16
    L = 8

    x = jax.random.normal(k1, (B, C, H, W), dtype=jnp.float32)
    # Deterministic bias-free Linear weights (torch-style U(-1/sqrt(fan_in), ...))
    w1 = jax.random.uniform(k2, (L, C), jnp.float32,
                            -1.0 / math.sqrt(C), 1.0 / math.sqrt(C))
    w2 = jax.random.uniform(k3, (C, L), jnp.float32,
                            -1.0 / math.sqrt(L), 1.0 / math.sqrt(L))

    y = se_block(x, w1, w2)
    y = jax.block_until_ready(y)

    # Plain-JAX reference (same math as the PyTorch module's forward).
    pooled_ref = jnp.mean(x, axis=(2, 3))
    h_ref = jnp.maximum(pooled_ref @ w1.T, 0.0)
    ref = (1.0 / (1.0 + jnp.exp(-(h_ref @ w2.T)))).reshape(B, C, 1, 1)

    assert y.shape == (B, C, 1, 1)
    assert jnp.allclose(y, ref, atol=1e-3, rtol=1e-3), "mismatch vs reference"

    print("KERNEL_OK")
</pallas_src>

<mosaic_0001>
module attributes {stable_mosaic.version = 11 : i64} {
  func.func @_gap_kernel(%arg0: i32, %arg1: i32, %arg2: memref<8x256xf32, #tpu.memory_space<vmem>>, %arg3: memref<8x1xf32, #tpu.memory_space<vmem>>) attributes {dimension_semantics = [#tpu.dimension_semantics<parallel>, #tpu.dimension_semantics<arbitrary>], iteration_bounds = array<i64: 1, 1>, scalar_prefetch = 0 : i64, scratch_operands = 0 : i64, tpu.core_type = #tpu.core_type<tc>, window_params = [{transform_indices = @transform_0, window_bounds = array<i64: 8, 256>}, {transform_indices = @transform_1, window_bounds = array<i64: 8, 1>}]} {
    %c0_i32 = arith.constant 0 : i32
    %0 = arith.cmpi eq, %arg1, %c0_i32 : i32
    %1 = arith.extui %0 : i1 to i32
    %c0_i32_0 = arith.constant 0 : i32
    %2 = arith.cmpi ne, %1, %c0_i32_0 : i32
    scf.if %2 {
      %cst_8 = arith.constant 0.000000e+00 : f32
      %12 = vector.broadcast %cst_8 : f32 to vector<8x1xf32>
      %c0_9 = arith.constant 0 : index
      %c0_10 = arith.constant 0 : index
      %13 = vector.load %arg3[%c0_9, %c0_10] : memref<8x1xf32, #tpu.memory_space<vmem>>, vector<8x1xf32>
      tpu.vector_store %arg3[%c0_9, %c0_10], %12 {strides = array<i32>} : memref<8x1xf32, #tpu.memory_space<vmem>>, vector<8x1xf32>,
    } else {
    }
    %c0 = arith.constant 0 : index
    %c0_1 = arith.constant 0 : index
    %3 = vector.load %arg2[%c0, %c0_1] : memref<8x256xf32, #tpu.memory_space<vmem>>, vector<8x256xf32>
    %c0_2 = arith.constant 0 : index
    %c0_3 = arith.constant 0 : index
    %4 = vector.load %arg3[%c0_2, %c0_3] : memref<8x1xf32, #tpu.memory_space<vmem>>, vector<8x1xf32>
    %cst = arith.constant dense<0.000000e+00> : vector<8xf32>
    %5 = vector.multi_reduction <add>, %3, %cst [1] : vector<8x256xf32> to vector<8xf32>
    %6 = vector.shape_cast %5 : vector<8xf32> to vector<8x1xf32>
    %7 = arith.addf %4, %6 : vector<8x1xf32>
    %c0_4 = arith.constant 0 : index
    %c0_5 = arith.constant 0 : index
    %8 = vector.load %arg3[%c0_4, %c0_5] : memref<8x1xf32, #tpu.memory_space<vmem>>, vector<8x1xf32>
    tpu.vector_store %arg3[%c0_4, %c0_5], %7 {strides = array<i32>} : memref<8x1xf32, #tpu.memory_space<vmem>>, vector<8x1xf32>,
    %c0_i32_6 = arith.constant 0 : i32
    %9 = arith.cmpi eq, %arg1, %c0_i32_6 : i32
    %10 = arith.extui %9 : i1 to i32
    %c0_i32_7 = arith.constant 0 : i32
    %11 = arith.cmpi ne, %10, %c0_i32_7 : i32
    scf.if %11 {
      %c0_8 = arith.constant 0 : index
      %c0_9 = arith.constant 0 : index
      %12 = vector.load %arg3[%c0_8, %c0_9] : memref<8x1xf32, #tpu.memory_space<vmem>>, vector<8x1xf32>
      %cst_10 = arith.constant 3.906250e-03 : f32
      %13 = vector.broadcast %cst_10 : f32 to vector<8x1xf32>
      %14 = arith.mulf %12, %13 : vector<8x1xf32>
      %c0_11 = arith.constant 0 : index
      %c0_12 = arith.constant 0 : index
      %15 = vector.load %arg3[%c0_11, %c0_12] : memref<8x1xf32, #tpu.memory_space<vmem>>, vector<8x1xf32>
      tpu.vector_store %arg3[%c0_11, %c0_12], %14 {strides = array<i32>} : memref<8x1xf32, #tpu.memory_space<vmem>>, vector<8x1xf32>,
    } else {
    }
    return
  }
  func.func @transform_0(%arg0: i32, %arg1: i32) -> (i32, i32) {
    %c0_i32 = arith.constant 0 : i32
    return %arg0, %arg1 : i32, i32
  }
  func.func @transform_1(%arg0: i32, %arg1: i32) -> (i32, i32) {
    %c0_i32 = arith.constant 0 : i32
    %c0_i32_0 = arith.constant 0 : i32
    return %arg0, %c0_i32 : i32, i32
  }
}

</mosaic_0001>

<bundles_post_ra>
// kernel: tpu_custom_call.1
= control target key start
LH: loop header
LB: loop body
LE: loop exit
PB: predicated region body
PF: predicated region fallthrough
CT: control target
= control target key end

     0   :  { %6 = vsyncpa [#allocation3], 0  ;;  %s72_s6 = smov [#allocation2]   ;;  %s111_s0 = inlined_call_operand.hbm [shape: f32[8,256], index: 0, kind: input, shape index: {}]   ;;  %s112_s1 = inlined_call_operand.vmem [shape: f32[8,1], index: 1, kind: output, shape index: {}]  }
   0x1   :  { %s13_s7 = sshll.u32 %s72_s6, 4  ;;  %s48_s10 = scalar_lea.hbm %s111_s0, 256  ;;  %s14_s7 = int_to_ptr.vmem [resolvable:$true] %s13_s7 }
   0x2   :  { %p49_p0 = scmp.ne.s32.totalorder %s111_s0, %s48_s10  ;;  %p52_p1 = scmp.lt.u32.totalorder %s48_s10, %s111_s0 }
   0x4   :  { %p54_p2 = pnand %p52_p1, %p49_p0 }
   0x6   :  { %57 = shalt.err (!%p54_p2)
}
   0x7   :  { %s58_s15 = scalar_lea.vmem %s14_s7, 256  ;;  %p63_p4 = scmp.lt.s32.totalorder %s14_s7, %s14_s7 }
   0x8   :  { %p59_p3 = scmp.ne.s32.totalorder %s14_s7, %s58_s15  ;;  %p64_p5 = scmp.lt.s32.totalorder %s58_s15, %s58_s15 }
   0xa   :  { %p65_p6 = por %p64_p5, %p63_p4 }
   0xc   :  { %p66_p7 = pnand %p65_p6, %p59_p3 }
   0xe   :  { %69 = shalt.err (!%p66_p7)
}
   0xf   :  { %16 = dma.hbm_to_vmem [thread:$0]  %s111_s0, 256, %s14_s7, [#allocation3]  }
  0x10   :  { %70 = dma.done.wait [#allocation3], 256  }
  0x11   :  { %71 = vsyncadd [#allocation3], 4294967040  ;;  %vm24_vm0 = vcmask 7168   ;;  %v73_v0 = vmov 0.0   ;;  %v26_v1 = vld [vmem:[#allocation2] sm:$0xff]  ;;  %v27_v2 = vld [vmem:[#allocation2 + $0x8] sm:$0xff] }
  0x12   :  { %25 = vst.msk [vmem:[%s112_s1] sm:$0xff] %vm24_vm0, %v73_v0  ;;  %v29_v3 = vadd.f32 %v27_v2, %v26_v1 }
  0x14   :  { %30 = vadd.xlane.f32.xlu0 %v29_v3 }
  0x19   :  { %v28_v4 = vld [vmem:[%s112_s1] sm:$0xff] }
  0xa1   :  { %v31_v5 = vpop.xlane.xlu0 %30 }
  0xa2   :  { %v32_v6 = vadd.f32 %v31_v5, %v28_v4 }
  0xa4   :  { %34 = vst.msk [vmem:[%s112_s1] sm:$0xff] %vm24_vm0, %v32_v6 }
  0xab   :  { %v38_v7 = vld [vmem:[%s112_s1] sm:$0xff] }
  0xac   :  { %v39_v8 = vmul.f32 0.00390625, %v38_v7 }
  0xae   :  { %40 = vst.msk [vmem:[%s112_s1] sm:$0xff] %vm24_vm0, %v39_v8 }
  0xaf   :  { %45 = vsyncpa [#allocation3], 1 }

</bundles_post_ra>
